<compile_context>
chip_gen: v7x
topology: tpu7x:2x2x1
jax: 0.10.0
libtpu: 0.0.40
codegen_flags: <defaults>
</compile_context>

<pallas_src>
import functools

import jax
import jax.numpy as jnp
from jax.experimental import pallas as pl
from jax.experimental.pallas import tpu as pltpu


def _round_up(v, m):
    return ((v + m - 1) // m) * m


def dqn_kernel(x_ref,
               w1_ref, w2_ref, w3_ref, w4_ref,
               b_ref,
               o_ref,
               *, compute_dtype, hidden):
    """Fused 4-layer MLP (3x ReLU) on one batch tile.

    x_ref : (tb, d_in)            f32
    w*_ref: (in_pad, out_pad)     compute_dtype (zero-padded to 128 lanes)
    b_ref : (4, out_pad_max)      f32 stacked biases
    o_ref : (tb, d_out_pad)       compute_dtype, lane-dense padded output
    """
    x = x_ref[...].astype(compute_dtype)
    b = b_ref[...]  # (4, W) f32

    h = jnp.dot(x, w1_ref[...], preferred_element_type=jnp.float32) + b[0:1, :hidden]
    h = jnp.maximum(h, 0.0).astype(compute_dtype)

    h = jnp.dot(h, w2_ref[...], preferred_element_type=jnp.float32) + b[1:2, :hidden]
    h = jnp.maximum(h, 0.0).astype(compute_dtype)

    h = jnp.dot(h, w3_ref[...], preferred_element_type=jnp.float32) + b[2:3, :hidden]
    h = jnp.maximum(h, 0.0).astype(compute_dtype)

    q = jnp.dot(h, w4_ref[...], preferred_element_type=jnp.float32) + b[3:4, :]
    o_ref[...] = q.astype(o_ref.dtype)


def prepare_dqn_params(params, *, use_bf16=True):
    """One-time pad/cast/stack of the Linear weights (call once, outside jit).

    Returns (prepared_dict, action_dim).  prepared_dict holds:
      w1..w4 : (in_pad, 128*) arrays in the compute dtype (bf16 or f32)
      b      : (4, out_pad) f32 stacked biases
    """
    w1, b1 = params["w1"], params["b1"]
    w2, b2 = params["w2"], params["b2"]
    w3, b3 = params["w3"], params["b3"]
    w4, b4 = params["w4"], params["b4"]

    d_in = w1.shape[0]
    d_out = w4.shape[1]
    H = 128                                      # padded hidden width (64, 124 -> 128)
    d_out_pad = max(128, _round_up(d_out, 128))  # lane-dense padded output width
    compute_dtype = jnp.bfloat16 if use_bf16 else jnp.float32

    def pad2(a, rows, cols):
        r, c = a.shape
        return jnp.pad(a, ((0, rows - r), (0, cols - c)))

    prepared = {
        "w1": pad2(w1, d_in, H).astype(compute_dtype),
        "w2": pad2(w2, H, H).astype(compute_dtype),
        "w3": pad2(w3, H, H).astype(compute_dtype),
        "w4": pad2(w4, H, d_out_pad).astype(compute_dtype),
        "b": jnp.concatenate(
            [pad2(b1, 1, d_out_pad), pad2(b2, 1, d_out_pad),
             pad2(b3, 1, d_out_pad), pad2(b4, 1, d_out_pad)], axis=0),
    }
    return prepared, d_out


@functools.partial(jax.jit, static_argnames=("action_dim", "batch_tile", "unpad"))
def dqn_forward(x, prepared, *, action_dim, batch_tile=2048, unpad=True):
    """x: (B, envstate_dim) f32; prepared: output of prepare_dqn_params.

    unpad=True returns (B, action_dim) (module semantics).  unpad=False
    returns the lane-dense (B, 128) padded slab (no extra slice pass);
    only the first `action_dim` lanes are meaningful.
    """
    B, d_in = x.shape
    w1p, w2p, w3p, w4p = prepared["w1"], prepared["w2"], prepared["w3"], prepared["w4"]
    b_stack = prepared["b"]
    assert w1p.shape[0] == d_in, "prepared params do not match input feature dim"

    H = w1p.shape[1]
    d_out_pad = w4p.shape[1]
    compute_dtype = w1p.dtype
    out_dtype = compute_dtype  # bf16 output on the bf16 path halves output HBM traffic

    # --- batch-tile selection -------------------------------------------------
    # As large as possible: each grid step costs ~0.35 us fixed overhead, more
    # than the DMA it issues at small tiles.  tb == B (full dim) for small
    # batches; otherwise align to the 16-row sublane pack so bf16 tiles are
    # unmasked.
    tb = min(batch_tile, B)
    if tb < B:
        tb = max(16, (tb // 16) * 16)
    grid = (pl.cdiv(B, tb),)

    full = lambda shape: pl.BlockSpec(shape, lambda i: (0, 0))

    kernel = functools.partial(dqn_kernel, compute_dtype=compute_dtype, hidden=H)

    out_padded = pl.pallas_call(
        kernel,
        out_shape=jax.ShapeDtypeStruct((B, d_out_pad), out_dtype),
        grid_spec=pltpu.PrefetchScalarGridSpec(
            num_scalar_prefetch=0,
            grid=grid,
            in_specs=[
                pl.BlockSpec((tb, d_in), lambda i: (i, 0)),   # x tile (batch-tiled)
                full(w1p.shape),
                full(w2p.shape),
                full(w3p.shape),
                full(w4p.shape),
                full(b_stack.shape),
            ],
            out_specs=pl.BlockSpec((tb, d_out_pad), lambda i: (i, 0)),
        ),
        compiler_params=pltpu.CompilerParams(
            dimension_semantics=("parallel",),   # shards grid steps across TCs on v7x
        ),
    )(x, w1p, w2p, w3p, w4p, b_stack)

    if unpad:
        return out_padded[:, :action_dim]
    return out_padded


def init_dqn_params(key, envstate_dim, action_dim):
    """Deterministic init mimicking PyTorch Linear default (U[-1/sqrt(fan_in), +])."""
    dims = [envstate_dim, 64, 124, 64, action_dim]
    params = {}
    for idx in range(4):
        fan_in, fan_out = dims[idx], dims[idx + 1]
        key, kw, kb = jax.random.split(key, 3)
        bound = 1.0 / jnp.sqrt(jnp.float32(fan_in))
        # Stored directly in (in, out) layout (i.e. W_torch.T).
        params[f"w{idx + 1}"] = jax.random.uniform(
            kw, (fan_in, fan_out), jnp.float32, -bound, bound)
        params[f"b{idx + 1}"] = jax.random.uniform(
            kb, (1, fan_out), jnp.float32, -bound, bound)
    return params


def dqn_reference(x, params):
    """Pure-JAX f32 reference of the same forward pass."""
    h = jnp.maximum(x @ params["w1"] + params["b1"], 0.0)
    h = jnp.maximum(h @ params["w2"] + params["b2"], 0.0)
    h = jnp.maximum(h @ params["w3"] + params["b3"], 0.0)
    return h @ params["w4"] + params["b4"]


if __name__ == "__main__":
    key = jax.random.PRNGKey(0)
    envstate_dim, action_dim = 16, 4

    key, kx, kp = jax.random.split(key, 3)
    params = init_dqn_params(kp, envstate_dim, action_dim)

    # One-time pad/cast (hoisted out of the per-call forward).
    prep_f32, d_out_f32 = prepare_dqn_params(params, use_bf16=False)
    prep_bf16, d_out_bf16 = prepare_dqn_params(params, use_bf16=True)
    assert d_out_f32 == action_dim and d_out_bf16 == action_dim

    # --- small single-tile case (exact f32 path, e.g. for TD targets) ---
    batch = 8
    x = jax.random.normal(kx, (batch, envstate_dim), jnp.float32)
    ref = dqn_reference(x, params)

    q_f32 = jax.block_until_ready(dqn_forward(x, prep_f32, action_dim=action_dim))
    assert q_f32.shape == (batch, action_dim)
    assert jnp.allclose(q_f32, ref, atol=1e-5, rtol=1e-5), "f32 mismatch vs reference"

    # --- default bf16 MXU-input / bf16-output acting path ---
    q_bf16 = jax.block_until_ready(dqn_forward(x, prep_bf16, action_dim=action_dim))
    assert q_bf16.shape == (batch, action_dim)
    assert jnp.allclose(q_bf16.astype(jnp.float32), ref, atol=5e-2, rtol=5e-2), \
        "bf16 mismatch vs reference"

    # --- multi-step grid with a partial last tile (exercises batch tiling) ---
    batch2 = 80
    key, kx2 = jax.random.split(key)
    x2 = jax.random.normal(kx2, (batch2, envstate_dim), jnp.float32)
    q2 = jax.block_until_ready(
        dqn_forward(x2, prep_f32, action_dim=action_dim, batch_tile=32))
    ref2 = dqn_reference(x2, params)
    assert q2.shape == (batch2, action_dim)
    assert jnp.allclose(q2, ref2, atol=1e-5, rtol=1e-5), "tiled f32 mismatch vs reference"

    # --- lane-dense padded output path (no post-slice; consumer slices/argmaxes) ---
    q_pad = jax.block_until_ready(
        dqn_forward(x, prep_bf16, action_dim=action_dim, unpad=False))
    assert q_pad.shape == (batch, 128)
    assert jnp.allclose(q_pad[:, :action_dim].astype(jnp.float32), ref,
                        atol=5e-2, rtol=5e-2), "padded-output mismatch vs reference"

    print("KERNEL_OK")
</pallas_src>

<mosaic_0001>
module attributes {stable_mosaic.version = 11 : i64} {
  func.func @dqn_kernel(%arg0: i32, %arg1: memref<8x16xf32, #tpu.memory_space<vmem>>, %arg2: memref<16x128xf32, #tpu.memory_space<vmem>>, %arg3: memref<128x128xf32, #tpu.memory_space<vmem>>, %arg4: memref<128x128xf32, #tpu.memory_space<vmem>>, %arg5: memref<128x128xf32, #tpu.memory_space<vmem>>, %arg6: memref<4x128xf32, #tpu.memory_space<vmem>>, %arg7: memref<8x128xf32, #tpu.memory_space<vmem>>) attributes {dimension_semantics = [#tpu.dimension_semantics<parallel>], iteration_bounds = array<i64: 1>, scalar_prefetch = 0 : i64, scratch_operands = 0 : i64, tpu.core_type = #tpu.core_type<tc>, window_params = [{transform_indices = @transform_0, window_bounds = array<i64: 8, 16>}, {pipeline_mode = #tpu.pipeline_mode<synchronous>, transform_indices = @transform_1, window_bounds = array<i64: 16, 128>}, {pipeline_mode = #tpu.pipeline_mode<synchronous>, transform_indices = @transform_2, window_bounds = array<i64: 128, 128>}, {pipeline_mode = #tpu.pipeline_mode<synchronous>, transform_indices = @transform_3, window_bounds = array<i64: 128, 128>}, {pipeline_mode = #tpu.pipeline_mode<synchronous>, transform_indices = @transform_4, window_bounds = array<i64: 128, 128>}, {pipeline_mode = #tpu.pipeline_mode<synchronous>, transform_indices = @transform_5, window_bounds = array<i64: 4, 128>}, {transform_indices = @transform_6, window_bounds = array<i64: 8, 128>}]} {
    %c0 = arith.constant 0 : index
    %c0_0 = arith.constant 0 : index
    %0 = vector.load %arg1[%c0, %c0_0] : memref<8x16xf32, #tpu.memory_space<vmem>>, vector<8x16xf32>
    %c0_1 = arith.constant 0 : index
    %c0_2 = arith.constant 0 : index
    %1 = vector.load %arg6[%c0_1, %c0_2] : memref<4x128xf32, #tpu.memory_space<vmem>>, vector<4x128xf32>
    %c0_3 = arith.constant 0 : index
    %c0_4 = arith.constant 0 : index
    %2 = vector.load %arg2[%c0_3, %c0_4] : memref<16x128xf32, #tpu.memory_space<vmem>>, vector<16x128xf32>
    %cst = arith.constant dense<0.000000e+00> : vector<8x128xf32>
    %3 = tpu.matmul %0, %2, %cst {dimension_numbers = #tpu.dot_dimension_numbers<[1], [0], [0], [1], [0, 0, 1, 1], [], []>} : vector<8x16xf32>, vector<16x128xf32>, vector<8x128xf32> -> vector<8x128xf32>
    %4 = vector.extract_strided_slice %1 {offsets = [0, 0], sizes = [1, 128], strides = [1, 1]} : vector<4x128xf32> to vector<1x128xf32>
    %5 = vector.broadcast %4 : vector<1x128xf32> to vector<8x128xf32>
    %6 = arith.addf %3, %5 : vector<8x128xf32>
    %cst_5 = arith.constant 0.000000e+00 : f32
    %7 = vector.broadcast %cst_5 : f32 to vector<8x128xf32>
    %8 = arith.maximumf %6, %7 : vector<8x128xf32>
    %c0_6 = arith.constant 0 : index
    %c0_7 = arith.constant 0 : index
    %9 = vector.load %arg3[%c0_6, %c0_7] : memref<128x128xf32, #tpu.memory_space<vmem>>, vector<128x128xf32>
    %cst_8 = arith.constant dense<0.000000e+00> : vector<8x128xf32>
    %10 = tpu.matmul %8, %9, %cst_8 {dimension_numbers = #tpu.dot_dimension_numbers<[1], [0], [0], [1], [0, 0, 1, 1], [], []>} : vector<8x128xf32>, vector<128x128xf32>, vector<8x128xf32> -> vector<8x128xf32>
    %11 = vector.extract_strided_slice %1 {offsets = [1, 0], sizes = [1, 128], strides = [1, 1]} : vector<4x128xf32> to vector<1x128xf32>
    %12 = vector.broadcast %11 : vector<1x128xf32> to vector<8x128xf32>
    %13 = arith.addf %10, %12 : vector<8x128xf32>
    %cst_9 = arith.constant 0.000000e+00 : f32
    %14 = vector.broadcast %cst_9 : f32 to vector<8x128xf32>
    %15 = arith.maximumf %13, %14 : vector<8x128xf32>
    %c0_10 = arith.constant 0 : index
    %c0_11 = arith.constant 0 : index
    %16 = vector.load %arg4[%c0_10, %c0_11] : memref<128x128xf32, #tpu.memory_space<vmem>>, vector<128x128xf32>
    %cst_12 = arith.constant dense<0.000000e+00> : vector<8x128xf32>
    %17 = tpu.matmul %15, %16, %cst_12 {dimension_numbers = #tpu.dot_dimension_numbers<[1], [0], [0], [1], [0, 0, 1, 1], [], []>} : vector<8x128xf32>, vector<128x128xf32>, vector<8x128xf32> -> vector<8x128xf32>
    %18 = vector.extract_strided_slice %1 {offsets = [2, 0], sizes = [1, 128], strides = [1, 1]} : vector<4x128xf32> to vector<1x128xf32>
    %19 = vector.broadcast %18 : vector<1x128xf32> to vector<8x128xf32>
    %20 = arith.addf %17, %19 : vector<8x128xf32>
    %cst_13 = arith.constant 0.000000e+00 : f32
    %21 = vector.broadcast %cst_13 : f32 to vector<8x128xf32>
    %22 = arith.maximumf %20, %21 : vector<8x128xf32>
    %c0_14 = arith.constant 0 : index
    %c0_15 = arith.constant 0 : index
    %23 = vector.load %arg5[%c0_14, %c0_15] : memref<128x128xf32, #tpu.memory_space<vmem>>, vector<128x128xf32>
    %cst_16 = arith.constant dense<0.000000e+00> : vector<8x128xf32>
    %24 = tpu.matmul %22, %23, %cst_16 {dimension_numbers = #tpu.dot_dimension_numbers<[1], [0], [0], [1], [0, 0, 1, 1], [], []>} : vector<8x128xf32>, vector<128x128xf32>, vector<8x128xf32> -> vector<8x128xf32>
    %25 = vector.extract_strided_slice %1 {offsets = [3, 0], sizes = [1, 128], strides = [1, 1]} : vector<4x128xf32> to vector<1x128xf32>
    %26 = vector.broadcast %25 : vector<1x128xf32> to vector<8x128xf32>
    %27 = arith.addf %24, %26 : vector<8x128xf32>
    %c0_17 = arith.constant 0 : index
    %c0_18 = arith.constant 0 : index
    %28 = vector.load %arg7[%c0_17, %c0_18] : memref<8x128xf32, #tpu.memory_space<vmem>>, vector<8x128xf32>
    tpu.vector_store %arg7[%c0_17, %c0_18], %27 {strides = array<i32>} : memref<8x128xf32, #tpu.memory_space<vmem>>, vector<8x128xf32>,
    return
  }
  func.func @transform_0(%arg0: i32) -> (i32, i32) {
    %c0_i32 = arith.constant 0 : i32
    %c0_i32_0 = arith.constant 0 : i32
    return %arg0, %c0_i32 : i32, i32
  }
  func.func @transform_1(%arg0: i32) -> (i32, i32) {
    %c0_i32 = arith.constant 0 : i32
    %c0_i32_0 = arith.constant 0 : i32
    %c0_i32_1 = arith.constant 0 : i32
    return %c0_i32, %c0_i32_0 : i32, i32
  }
  func.func @transform_2(%arg0: i32) -> (i32, i32) {
    %c0_i32 = arith.constant 0 : i32
    %c0_i32_0 = arith.constant 0 : i32
    %c0_i32_1 = arith.constant 0 : i32
    return %c0_i32, %c0_i32_0 : i32, i32
  }
  func.func @transform_3(%arg0: i32) -> (i32, i32) {
    %c0_i32 = arith.constant 0 : i32
    %c0_i32_0 = arith.constant 0 : i32
    %c0_i32_1 = arith.constant 0 : i32
    return %c0_i32, %c0_i32_0 : i32, i32
  }
  func.func @transform_4(%arg0: i32) -> (i32, i32) {
    %c0_i32 = arith.constant 0 : i32
    %c0_i32_0 = arith.constant 0 : i32
    %c0_i32_1 = arith.constant 0 : i32
    return %c0_i32, %c0_i32_0 : i32, i32
  }
  func.func @transform_5(%arg0: i32) -> (i32, i32) {
    %c0_i32 = arith.constant 0 : i32
    %c0_i32_0 = arith.constant 0 : i32
    %c0_i32_1 = arith.constant 0 : i32
    return %c0_i32, %c0_i32_0 : i32, i32
  }
  func.func @transform_6(%arg0: i32) -> (i32, i32) {
    %c0_i32 = arith.constant 0 : i32
    %c0_i32_0 = arith.constant 0 : i32
    return %arg0, %c0_i32 : i32, i32
  }
}

</mosaic_0001>

<bundles_post_ra>
// kernel: dqn_forward.1
= control target key start
LH: loop header
LB: loop body
LE: loop exit
PB: predicated region body
PF: predicated region fallthrough
CT: control target
= control target key end

     0   :  { %11 = vsyncpa [#allocation3], 0  ;;  %s1036_s0 = inlined_call_operand.hbm [shape: f32[8,16], index: 0, kind: input, shape index: {}]   ;;  %s1037_s1 = inlined_call_operand.hbm [shape: f32[16,128], index: 1, kind: input, shape index: {}]   ;;  %s1038_s2 = inlined_call_operand.hbm [shape: f32[128,128], index: 2, kind: input, shape index: {}]   ;;  %s1039_s3 = inlined_call_operand.hbm [shape: f32[128,128], index: 3, kind: input, shape index: {}]   ;;  %s1040_s4 = inlined_call_operand.hbm [shape: f32[128,128], index: 4, kind: input, shape index: {}]   ;;  %s1041_s5 = inlined_call_operand.hbm [shape: f32[4,128], index: 5, kind: input, shape index: {}]   ;;  %s1042_s6 = inlined_call_operand.vmem [shape: f32[8,128], index: 6, kind: output, shape index: {}]  }
   0x1   :  { %12 = vsyncpa [#allocation5], 0 }
   0x2   :  { %13 = vsyncpa [#allocation8], 0 }
   0x3   :  { %14 = vsyncpa [#allocation11], 0  ;;  %s858_s21 = smov [#allocation4]   ;;  %s718_s25 = scalar_lea.hbm %s1037_s1, 256 }
   0x4   :  { %s30_s22 = sshll.u32 %s858_s21, 4  ;;  %p719_p0 = scmp.ne.s32.totalorder %s1037_s1, %s718_s25  ;;  %s31_s22 = int_to_ptr.vmem [resolvable:$true] %s30_s22 }
   0x5   :  { %p722_p1 = scmp.lt.u32.totalorder %s718_s25, %s1037_s1 }
   0x7   :  { %p724_p2 = pnand %p722_p1, %p719_p0 }
   0x9   :  { %727 = shalt.err (!%p724_p2)
}
   0xa   :  { %s728_s30 = scalar_lea.vmem %s31_s22, 256  ;;  %p733_p4 = scmp.lt.s32.totalorder %s31_s22, %s31_s22 }
   0xb   :  { %p729_p3 = scmp.ne.s32.totalorder %s31_s22, %s728_s30  ;;  %p734_p5 = scmp.lt.s32.totalorder %s728_s30, %s728_s30 }
   0xd   :  { %p735_p6 = por %p734_p5, %p733_p4 }
   0xf   :  { %p736_p7 = pnand %p735_p6, %p729_p3 }
  0x11   :  { %739 = shalt.err (!%p736_p7)
}
  0x12   :  { %s859_s7 = smov 128   ;;  %s860_s8 = smov 8  }
  0x13   :  { %36 = dma.hbm_to_vmem [thread:$0]  %s1037_s1, 256, %s31_s22, [#allocation5], %s859_s7, %s859_s7, %s860_s8  }
  0x14   :  { %s861_s11 = smov [#allocation7]   ;;  %s862_s13 = smov [#allocation2]  }
  0x15   :  { %s54_s12 = sshll.u32 %s861_s11, 4  ;;  %s21_s14 = sshll.u32 %s862_s13, 4  ;;  %s55_s12 = int_to_ptr.vmem [resolvable:$true] %s54_s12  ;;  %s22_s14 = int_to_ptr.vmem [resolvable:$true] %s21_s14 }
  0x16   :  { %s740_s17 = scalar_lea.hbm %s1039_s3, 2048 }
  0x17   :  { %p741_p8 = scmp.ne.s32.totalorder %s1039_s3, %s740_s17  ;;  %p744_p9 = scmp.lt.u32.totalorder %s740_s17, %s1039_s3 }
  0x19   :  { %p746_p10 = pnand %p744_p9, %p741_p8 }
  0x1b   :  { %749 = shalt.err (!%p746_p10)
}
  0x1c   :  { %s750_s1 = scalar_lea.vmem %s55_s12, 2048  ;;  %p755_p12 = scmp.lt.s32.totalorder %s55_s12, %s55_s12 }
  0x1d   :  { %p751_p11 = scmp.ne.s32.totalorder %s55_s12, %s750_s1  ;;  %p756_p13 = scmp.lt.s32.totalorder %s750_s1, %s750_s1 }
  0x1f   :  { %p757_p0 = por %p756_p13, %p755_p12 }
  0x21   :  { %p758_p1 = pnand %p757_p0, %p751_p11 }
  0x23   :  { %761 = shalt.err (!%p758_p1)
}
  0x24   :  { %60 = dma.hbm_to_vmem [thread:$0]  %s1039_s3, 2048, %s55_s12, [#allocation8], %s859_s7, %s859_s7, %s860_s8  }
  0x25   :  { %s762_s26 = scalar_lea.hbm %s1036_s0, 128 }
  0x26   :  { %p763_p2 = scmp.ne.s32.totalorder %s1036_s0, %s762_s26  ;;  %p766_p3 = scmp.lt.u32.totalorder %s762_s26, %s1036_s0 }
  0x28   :  { %p768_p4 = pnand %p766_p3, %p763_p2 }
  0x2a   :  { %771 = shalt.err (!%p768_p4)
}
  0x2b   :  { %s772_s9 = scalar_lea.vmem %s22_s14, 128  ;;  %p777_p6 = scmp.lt.s32.totalorder %s22_s14, %s22_s14 }
  0x2c   :  { %p773_p5 = scmp.ne.s32.totalorder %s22_s14, %s772_s9  ;;  %p778_p7 = scmp.lt.s32.totalorder %s772_s9, %s772_s9 }
  0x2e   :  { %p779_p8 = por %p778_p7, %p777_p6 }
  0x30   :  { %p780_p9 = pnand %p779_p8, %p773_p5 }
  0x32   :  { %783 = shalt.err (!%p780_p9)
}
  0x33   :  { %24 = dma.hbm_to_vmem [thread:$0]  %s1036_s0, 128, %s22_s14, [#allocation3]  }
  0x34   :  { %s863_s11 = smov [#allocation6]   ;;  %s864_s13 = smov [#allocation9]  }
  0x35   :  { %s42_s12 = sshll.u32 %s863_s11, 4  ;;  %s66_s15 = sshll.u32 %s864_s13, 4  ;;  %s43_s12 = int_to_ptr.vmem [resolvable:$true] %s42_s12  ;;  %s67_s15 = int_to_ptr.vmem [resolvable:$true] %s66_s15 }
  0x36   :  { %s784_s18 = scalar_lea.hbm %s1038_s2, 2048 }
  0x37   :  { %p785_p10 = scmp.ne.s32.totalorder %s1038_s2, %s784_s18  ;;  %p788_p11 = scmp.lt.u32.totalorder %s784_s18, %s1038_s2 }
  0x39   :  { %p790_p12 = pnand %p788_p11, %p785_p10 }
  0x3b   :  { %793 = shalt.err (!%p790_p12)
}
  0x3c   :  { %s794_s0 = scalar_lea.vmem %s43_s12, 2048  ;;  %p799_p0 = scmp.lt.s32.totalorder %s43_s12, %s43_s12 }
  0x3d   :  { %p795_p13 = scmp.ne.s32.totalorder %s43_s12, %s794_s0  ;;  %p800_p1 = scmp.lt.s32.totalorder %s794_s0, %s794_s0 }
  0x3f   :  { %p801_p2 = por %p800_p1, %p799_p0 }
  0x41   :  { %p802_p3 = pnand %p801_p2, %p795_p13 }
  0x43   :  { %805 = shalt.err (!%p802_p3)
}
  0x44   :  { %48 = dma.hbm_to_vmem [thread:$0]  %s1038_s2, 2048, %s43_s12, [#allocation5], %s859_s7, %s859_s7, %s860_s8  }
  0x45   :  { %s806_s25 = scalar_lea.hbm %s1040_s4, 2048 }
  0x46   :  { %p807_p4 = scmp.ne.s32.totalorder %s1040_s4, %s806_s25  ;;  %p810_p5 = scmp.lt.u32.totalorder %s806_s25, %s1040_s4 }
  0x48   :  { %p812_p6 = pnand %p810_p5, %p807_p4 }
  0x4a   :  { %815 = shalt.err (!%p812_p6)
}
  0x4b   :  { %s816_s30 = scalar_lea.vmem %s67_s15, 2048  ;;  %p821_p8 = scmp.lt.s32.totalorder %s67_s15, %s67_s15 }
  0x4c   :  { %p817_p7 = scmp.ne.s32.totalorder %s67_s15, %s816_s30  ;;  %p822_p9 = scmp.lt.s32.totalorder %s816_s30, %s816_s30 }
  0x4e   :  { %p823_p10 = por %p822_p9, %p821_p8 }
  0x50   :  { %p824_p11 = pnand %p823_p10, %p817_p7 }
  0x52   :  { %827 = shalt.err (!%p824_p11)
}
  0x53   :  { %72 = dma.hbm_to_vmem [thread:$0]  %s1040_s4, 2048, %s67_s15, [#allocation8], %s859_s7, %s859_s7, %s860_s8  }
  0x54   :  { %s865_s3 = smov [#allocation10]   ;;  %s828_s13 = scalar_lea.hbm %s1041_s5, 64 }
  0x55   :  { %s79_s10 = sshll.u32 %s865_s3, 4  ;;  %p829_p12 = scmp.ne.s32.totalorder %s1041_s5, %s828_s13  ;;  %s80_s10 = int_to_ptr.vmem [resolvable:$true] %s79_s10 }
  0x56   :  { %p832_p13 = scmp.lt.u32.totalorder %s828_s13, %s1041_s5 }
  0x58   :  { %p834_p0 = pnand %p832_p13, %p829_p12 }
  0x5a   :  { %837 = shalt.err (!%p834_p0)
}
  0x5b   :  { %s838_s20 = scalar_lea.vmem %s80_s10, 64  ;;  %p843_p2 = scmp.lt.s32.totalorder %s80_s10, %s80_s10 }
  0x5c   :  { %p839_p1 = scmp.ne.s32.totalorder %s80_s10, %s838_s20  ;;  %p844_p3 = scmp.lt.s32.totalorder %s838_s20, %s838_s20 }
  0x5e   :  { %p845_p4 = por %p844_p3, %p843_p2 }
  0x60   :  { %p846_p5 = pnand %p845_p4, %p839_p1 }
  0x62   :  { %849 = shalt.err (!%p846_p5)
}
  0x63   :  { %82 = dma.hbm_to_vmem [thread:$0]  %s1041_s5, 64, %s80_s10, [#allocation11]  }
  0x64   :  { %850 = dma.done.wait [#allocation3], 128  }
  0x65   :  { %851 = vsyncadd [#allocation3], 4294967168 }
  0x66   :  { %852 = dma.done.wait [#allocation5], 2304  }
  0x67   :  { %853 = vsyncadd [#allocation5], 4294964992 }
  0x68   :  { %854 = dma.done.wait [#allocation8], 4096  }
  0x69   :  { %855 = vsyncadd [#allocation8], 4294963200 }
  0x6a   :  { %856 = dma.done.wait [#allocation11], 64  }
  0x6b   :  { %857 = vsyncadd [#allocation11], 4294967232  ;;  %v866_v0 = vmov 0.0|0.0   ;;  %vm867_vm0 = vmmov 0   ;;  %v868_v1 = vmov 0.0   ;;  %v103_v2 = vld [vmem:[#allocation4] sm:$0xff]  ;;  %v105_v51 = vlaneseq }
  0x6c   :  { %632 = vmatprep.subr.bf16.mxu0 %v866_v0  ;;  %524 = vmatprep.mubr.msk.f32.mxu0 %vm867_vm0, %v868_v1  ;;  %v104_v3 = vld [vmem:[#allocation4 + $0x8] sm:$0xff]  ;;  %v184_v5 = vld [vmem:[#allocation6] sm:$0xff]  ;;  %v185_v6 = vld [vmem:[#allocation6 + $0x8] sm:$0xff]  ;;  %vm109_vm1 = vcmask 130048  }
  0x6d   :  { %635 = vmatprep.subr.bf16.mxu1 %v866_v0  ;;  %559 = vmatprep.mubr.msk.f32.mxu1 %vm867_vm0, %v868_v1  ;;  %v633_v4 = vpack.c.bf16 %v104_v3, %v103_v2  ;;  %v186_v7 = vld [vmem:[#allocation6 + $0x10] sm:$0xff]  ;;  %v636_v8 = vpack.c.bf16 %v185_v6, %v184_v5  ;;  %v187_v9 = vld [vmem:[#allocation6 + $0x18] sm:$0xff]  ;;  %v101_v10 = vld [vmem:[#allocation2] sm:$0xff]  ;;  %v1012_v52 = vshrl.u32 %v105_v51, 7 }
  0x6e   :  { %v639_v11 = vpack.c.bf16 %v187_v9, %v186_v7  ;;  %v188_v12 = vld [vmem:[#allocation6 + $0x20] sm:$0xff]  ;;  %v189_v13 = vld [vmem:[#allocation6 + $0x28] sm:$0xff]  ;;  %v190_v15 = vld [vmem:[#allocation6 + $0x30] sm:$0xff] }
  0x6f   :  { %634 = vmatpush3.bf16.msra.mxu0 %v633_v4  ;;  %637 = vmatpush3.bf16.msra.mxu1 %v636_v8  ;;  %v642_v14 = vpack.c.bf16 %v189_v13, %v188_v12  ;;  %v191_v16 = vld [vmem:[#allocation6 + $0x38] sm:$0xff]  ;;  %v192_v18 = vld [vmem:[#allocation6 + $0x40] sm:$0xff]  ;;  %v193_v19 = vld [vmem:[#allocation6 + $0x48] sm:$0xff]  ;;  %v107_v53 = vsub.s32 0, %v1012_v52 }
  0x70   :  { %659 = vmatprep.subr.bf16.mxu0 %v866_v0  ;;  %638 = vmatprep.subr.bf16.mxu1 %v866_v0  ;;  %v645_v17 = vpack.c.bf16 %v191_v16, %v190_v15  ;;  %v648_v20 = vpack.c.bf16 %v193_v19, %v192_v18  ;;  %v194_v21 = vld [vmem:[#allocation6 + $0x50] sm:$0xff]  ;;  %v195_v22 = vld [vmem:[#allocation6 + $0x58] sm:$0xff]  ;;  %v196_v24 = vld [vmem:[#allocation6 + $0x60] sm:$0xff] }
  0x71   :  { %v651_v23 = vpack.c.bf16 %v195_v22, %v194_v21  ;;  %v197_v25 = vld [vmem:[#allocation6 + $0x68] sm:$0xff]  ;;  %v198_v27 = vld [vmem:[#allocation6 + $0x70] sm:$0xff]  ;;  %v199_v28 = vld [vmem:[#allocation6 + $0x78] sm:$0xff]  ;;  %v202_v21 = vsub.s32 1, %v1012_v52 }
  0x72   :  { %525 = vmatmul.mubr.msk.f32.vlgmr.msra.gmra.mrb[0].mxu0 %vm109_vm1, %v101_v10  ;;  %v654_v26 = vpack.c.bf16 %v197_v25, %v196_v24  ;;  %v657_v29 = vpack.c.bf16 %v199_v28, %v198_v27  ;;  %v275_v30 = vld [vmem:[#allocation7] sm:$0xff]  ;;  %v276_v31 = vld [vmem:[#allocation7 + $0x8] sm:$0xff]  ;;  %v277_v32 = vld [vmem:[#allocation7 + $0x10] sm:$0xff] }
  0x73   :  { %594 = vmatprep.mubr.msk.f32.mxu0 %vm867_vm0, %v868_v1  ;;  %640 = vmatpush3.bf16.msra.mxu1 %v639_v11  ;;  %v660_v33 = vpack.c.bf16 %v276_v31, %v275_v30  ;;  %v278_v34 = vld [vmem:[#allocation7 + $0x18] sm:$0xff]  ;;  %v279_v36 = vld [vmem:[#allocation7 + $0x20] sm:$0xff]  ;;  %v280_v37 = vld [vmem:[#allocation7 + $0x28] sm:$0xff]  ;;  %v293_v30 = vsub.s32 2, %v1012_v52 }
  0x74   :  { %641 = vmatprep.subr.bf16.mxu1 %v866_v0  ;;  %v663_v35 = vpack.c.bf16 %v278_v34, %v277_v32  ;;  %v666_v38 = vpack.c.bf16 %v280_v37, %v279_v36  ;;  %v281_v39 = vld [vmem:[#allocation7 + $0x30] sm:$0xff]  ;;  %v282_v40 = vld [vmem:[#allocation7 + $0x38] sm:$0xff]  ;;  %v283_v42 = vld [vmem:[#allocation7 + $0x40] sm:$0xff] }
  0x75   :  { %661 = vmatpush3.bf16.msra.mxu0 %v660_v33  ;;  %v669_v41 = vpack.c.bf16 %v282_v40, %v281_v39  ;;  %v284_v43 = vld [vmem:[#allocation7 + $0x48] sm:$0xff]  ;;  %v285_v45 = vld [vmem:[#allocation7 + $0x50] sm:$0xff]  ;;  %v286_v46 = vld [vmem:[#allocation7 + $0x58] sm:$0xff] }
  0x76   :  { %662 = vmatprep.subr.bf16.mxu0 %v866_v0  ;;  %v672_v44 = vpack.c.bf16 %v284_v43, %v283_v42  ;;  %v675_v47 = vpack.c.bf16 %v286_v46, %v285_v45  ;;  %v287_v48 = vld [vmem:[#allocation7 + $0x60] sm:$0xff]  ;;  %v288_v49 = vld [vmem:[#allocation7 + $0x68] sm:$0xff]  ;;  %v289_v60 = vld [vmem:[#allocation7 + $0x70] sm:$0xff] }
  0x77   :  { %643 = vmatpush3.bf16.msra.mxu1 %v642_v14  ;;  %v678_v50 = vpack.c.bf16 %v288_v49, %v287_v48  ;;  %v1015_v54 = vld [vmem:[#allocation10] sm:$0xf]  ;;  %v290_v61 = vld [vmem:[#allocation7 + $0x78] sm:$0xff]  ;;  %v367_v2 = vld [vmem:[#allocation9 + $0x8] sm:$0xff] }
  0x78   :  { %644 = vmatprep.subr.bf16.mxu1 %v866_v0  ;;  %v108_v55 = vrot.slane %v1015_v54, %v107_v53  ;;  %v681_v62 = vpack.c.bf16 %v290_v61, %v289_v60  ;;  %v366_v63 = vld [vmem:[#allocation9] sm:$0xff]  ;;  %v368_v3 = vld [vmem:[#allocation9 + $0x10] sm:$0xff]  ;;  %v369_v5 = vld [vmem:[#allocation9 + $0x18] sm:$0xff]  ;;  %v203_v22 = vrot.slane %v1015_v54, %v202_v21  ;;  %v294_v31 = vrot.slane %v1015_v54, %v293_v30 }
  0x79   :  { %664 = vmatpush3.bf16.msra.mxu0 %v663_v35  ;;  %v684_v4 = vpack.c.bf16 %v367_v2, %v366_v63  ;;  %v687_v6 = vpack.c.bf16 %v369_v5, %v368_v3  ;;  %v370_v7 = vld [vmem:[#allocation9 + $0x20] sm:$0xff]  ;;  %v371_v8 = vld [vmem:[#allocation9 + $0x28] sm:$0xff]  ;;  %v373_v10 = vld [vmem:[#allocation9 + $0x38] sm:$0xff]  ;;  %v384_v35 = vsub.s32 3, %v1012_v52 }
  0x7a   :  { %665 = vmatprep.subr.bf16.mxu0 %v866_v0  ;;  %v690_v9 = vpack.c.bf16 %v371_v8, %v370_v7  ;;  %v374_v12 = vld [vmem:[#allocation9 + $0x40] sm:$0xff]  ;;  %v375_v13 = vld [vmem:[#allocation9 + $0x48] sm:$0xff]  ;;  %v376_v15 = vld [vmem:[#allocation9 + $0x50] sm:$0xff] }
  0x7b   :  { %646 = vmatpush3.bf16.msra.mxu1 %v645_v17  ;;  %v696_v14 = vpack.c.bf16 %v375_v13, %v374_v12  ;;  %v377_v16 = vld [vmem:[#allocation9 + $0x58] sm:$0xff]  ;;  %v378_v18 = vld [vmem:[#allocation9 + $0x60] sm:$0xff]  ;;  %v379_v19 = vld [vmem:[#allocation9 + $0x68] sm:$0xff]  ;;  %v385_v36 = vrot.slane %v1015_v54, %v384_v35 }
  0x7c   :  { %647 = vmatprep.subr.bf16.mxu1 %v866_v0  ;;  %v699_v17 = vpack.c.bf16 %v377_v16, %v376_v15  ;;  %v380_v27 = vld [vmem:[#allocation9 + $0x70] sm:$0xff]  ;;  %v381_v28 = vld [vmem:[#allocation9 + $0x78] sm:$0xff] }
  0x7d   :  { %667 = vmatpush3.bf16.msra.mxu0 %v666_v38 }
  0x7e   :  { %668 = vmatprep.subr.bf16.mxu0 %v866_v0 }
  0x7f   :  { %649 = vmatpush3.bf16.msra.mxu1 %v648_v20  ;;  %v702_v20 = vpack.c.bf16 %v379_v19, %v378_v18 }
  0x80   :  { %650 = vmatprep.subr.bf16.mxu1 %v866_v0 }
  0x81   :  { %670 = vmatpush3.bf16.msra.mxu0 %v669_v41 }
  0x82   :  { %671 = vmatprep.subr.bf16.mxu0 %v866_v0 }
  0x83   :  { %652 = vmatpush3.bf16.msra.mxu1 %v651_v23 }
  0x84   :  { %653 = vmatprep.subr.bf16.mxu1 %v866_v0 }
  0x85   :  { %673 = vmatpush3.bf16.msra.mxu0 %v672_v44 }
  0x86   :  { %674 = vmatprep.subr.bf16.mxu0 %v866_v0 }
  0x87   :  { %655 = vmatpush3.bf16.msra.mxu1 %v654_v26 }
  0x88   :  { %656 = vmatprep.subr.bf16.mxu1 %v866_v0 }
  0x89   :  { %676 = vmatpush3.bf16.msra.mxu0 %v675_v47 }
  0x8a   :  { %677 = vmatprep.subr.bf16.mxu0 %v866_v0 }
  0x8b   :  { %658 = vmatpush3.bf16.msra.mxu1 %v657_v29  ;;  %v705_v29 = vpack.c.bf16 %v381_v28, %v380_v27 }
  0x8c   :  { %683 = vmatprep.subr.bf16.mxu1 %v866_v0 }
  0x8d   :  { %679 = vmatpush3.bf16.msra.mxu0 %v678_v50 }
  0x8e   :  { %680 = vmatprep.subr.bf16.mxu0 %v866_v0 }
  0x91   :  { %682 = vmatpush3.bf16.msra.mxu0 %v681_v62 }
 0x145   :  { %v179_v56 = vpop.f32.mrb[0].mxu0 }
 0x146   :  { %v180_v57 = vadd.f32 %v179_v56, %v108_v55  ;;  %v526_v58 = vpop.f32.mrb[1].mxu0 }
 0x148   :  { %v183_v59 = vmax.f32 %v180_v57, 0.0 }
 0x14a   :  { %560 = vmatmul.mubr.f32.vlgmr.msra.gmra.mrb[0].mxu1 %v183_v59 }
 0x14b   :  { %629 = vmatprep.mubr.msk.f32.mxu1 %vm867_vm0, %v868_v1  ;;  %685 = vmatpush3.bf16.msra.mxu1 %v684_v4  ;;  %v372_v1 = vld [vmem:[#allocation9 + $0x30] sm:$0xff] }
 0x14c   :  { %686 = vmatprep.subr.bf16.mxu1 %v866_v0  ;;  %v693_v11 = vpack.c.bf16 %v373_v10, %v372_v1 }
 0x14f   :  { %688 = vmatpush3.bf16.msra.mxu1 %v687_v6 }
 0x150   :  { %689 = vmatprep.subr.bf16.mxu1 %v866_v0 }
 0x153   :  { %691 = vmatpush3.bf16.msra.mxu1 %v690_v9 }
 0x154   :  { %692 = vmatprep.subr.bf16.mxu1 %v866_v0 }
 0x157   :  { %694 = vmatpush3.bf16.msra.mxu1 %v693_v11 }
 0x158   :  { %695 = vmatprep.subr.bf16.mxu1 %v866_v0 }
 0x15b   :  { %697 = vmatpush3.bf16.msra.mxu1 %v696_v14 }
 0x15c   :  { %698 = vmatprep.subr.bf16.mxu1 %v866_v0 }
 0x15f   :  { %700 = vmatpush3.bf16.msra.mxu1 %v699_v17 }
 0x160   :  { %701 = vmatprep.subr.bf16.mxu1 %v866_v0 }
 0x163   :  { %703 = vmatpush3.bf16.msra.mxu1 %v702_v20 }
 0x164   :  { %704 = vmatprep.subr.bf16.mxu1 %v866_v0 }
 0x167   :  { %706 = vmatpush3.bf16.msra.mxu1 %v705_v29 }
 0x21d   :  { %v270_v23 = vpop.f32.mrb[0].mxu1 }
 0x21e   :  { %v271_v24 = vadd.f32 %v270_v23, %v203_v22  ;;  %v561_v25 = vpop.f32.mrb[1].mxu1 }
 0x220   :  { %v274_v26 = vmax.f32 %v271_v24, 0.0 }
 0x222   :  { %595 = vmatmul.mubr.f32.vlgmr.msra.gmra.mrb[2].mxu0 %v274_v26 }
 0x2f5   :  { %v361_v32 = vpop.f32.mrb[2].mxu0 }
 0x2f6   :  { %v362_v33 = vadd.f32 %v361_v32, %v294_v31  ;;  %v596_v0 = vpop.f32.mrb[3].mxu0 }
 0x2f8   :  { %v365_v34 = vmax.f32 %v362_v33, 0.0 }
 0x2fa   :  { %630 = vmatmul.mubr.f32.vlgmr.msra.gmra.mrb[2].mxu1 %v365_v34 }
 0x3cd   :  { %v452_v37 = vpop.f32.mrb[2].mxu1 }
 0x3ce   :  { %v453_v38 = vadd.f32 %v452_v37, %v385_v36  ;;  %v631_v39 = vpop.f32.mrb[3].mxu1 }
 0x3d0   :  { %456 = vst [vmem:[%s1042_s6] sm:$0xff] %v453_v38 }
 0x3d1   :  { %461 = vsyncpa [#allocation3], 1 }
 0x3d2   :  { %462 = vsyncpa [#allocation5], 1 }
 0x3d3   :  { %463 = vsyncpa [#allocation8], 1 }
 0x3d4   :  { %464 = vsyncpa [#allocation11], 1 }

</bundles_post_ra>
